<compile_context>
chip_gen: v5e
topology: v5e:2x2
jax: 0.10.0
libtpu: 0.0.40
codegen_flags: <defaults>
</compile_context>

<pallas_src>
import functools

import numpy as np
import jax
import jax.numpy as jnp
from jax import lax
from jax.experimental import pallas as pl
from jax.experimental.pallas import tpu as pltpu

LANE = 128


def _round_up(x, m):
    return ((x + m - 1) // m) * m


def normalize_adj(A):
    """A_norm = D^{-1/2} (A + I) D^{-1/2}   (plain-JAX glue, runs once)."""
    I = jnp.eye(A.shape[0], dtype=A.dtype)
    A_hat = A + I
    D = jnp.sum(A_hat, axis=1)
    d_inv_sqrt = jnp.power(D, -0.5)
    return (A_hat * d_inv_sqrt[:, None]) * d_inv_sqrt[None, :]


def _pick_tiles(n):
    """(tm, tk) tiles for the N x N aggregation.  tk is always a multiple of
    tm, so n_pad = round_up(n, tk) is divisible by both.  Sized so a
    double-buffered bf16 A block plus S / W2 / out / acc stays ~5-6 MiB --
    comfortably within v5e/v6e/v7x scoped-VMEM limits while large enough that
    HBM bandwidth (not the ~0.35 us/step grid overhead) is the bound."""
    if n >= 2048:
        return 512, 2048
    if n >= 1024:
        return 512, 1024
    if n >= 512:
        return 256, 512
    if n >= 256:
        return 256, 256
    return 128, 128


def _vmem_limit(buffer_bytes):
    """Explicit scoped-VMEM limit: 2x the computed buffer budget, clamped to
    [16 MiB, 32 MiB] (v5e default is 16 MiB; 32 MiB is safe everywhere)."""
    return int(min(max(2 * buffer_bytes, 16 * 2**20), 32 * 2**20))


# ---------------------------------------------------------------------------
# Kernel 1: feature transform  S = X @ W   (tiled over node rows, W resident)
# ---------------------------------------------------------------------------
def _xw_kernel(x_ref, w_ref, s_ref):
    s_ref[...] = jnp.dot(
        x_ref[...], w_ref[...], preferred_element_type=jnp.float32
    ).astype(s_ref.dtype)


def _transform(x, w, *, row_tile):
    n_pad, f_in = x.shape
    f_out = w.shape[1]
    buf = (2 * row_tile * f_in * 2      # X blocks, double buffered
           + 2 * f_in * f_out * 2       # resident W (double buffered)
           + 2 * row_tile * f_out * 2)  # output blocks
    return pl.pallas_call(
        _xw_kernel,
        out_shape=jax.ShapeDtypeStruct((n_pad, f_out), jnp.bfloat16),
        grid_spec=pltpu.PrefetchScalarGridSpec(
            num_scalar_prefetch=0,
            grid=(n_pad // row_tile,),
            in_specs=[
                pl.BlockSpec((row_tile, f_in), lambda i: (i, 0)),
                pl.BlockSpec((f_in, f_out), lambda i: (0, 0)),
            ],
            out_specs=pl.BlockSpec((row_tile, f_out), lambda i: (i, 0)),
        ),
        compiler_params=pltpu.CompilerParams(
            dimension_semantics=("parallel",),
            vmem_limit_bytes=_vmem_limit(buf)),
        cost_estimate=pl.CostEstimate(
            flops=2 * n_pad * f_in * f_out,
            transcendentals=0,
            bytes_accessed=int(x.size * 2 + w.size * 2 + n_pad * f_out * 2),
        ),
    )(x, w)


# ---------------------------------------------------------------------------
# Kernel 2: block-sparse aggregation  A @ S with f32 VMEM accumulator.
#   grid = (row tiles, max nonzero K-blocks per row tile); the K axis walks a
#   compact, scalar-prefetched list of nonzero adjacency blocks (zero blocks
#   are never DMA'd or matmul'd).
#   Finalize variant A: relu(acc) @ W2  (fused layer-2 transform, bf16 out)
#   Finalize variant B: masked log_softmax over classes (f32 out)
# ---------------------------------------------------------------------------
def _agg_relu_w2_kernel(bids_ref, cnts_ref, a_ref, s_ref, w2_ref, o_ref,
                        acc_ref):
    i = pl.program_id(0)
    k = pl.program_id(1)
    cnt = cnts_ref[i]

    @pl.when(k == 0)
    def _():
        acc_ref[...] = jnp.dot(a_ref[...], s_ref[...],
                               preferred_element_type=jnp.float32)

    @pl.when(jnp.logical_and(k > 0, k < cnt))
    def _():
        acc_ref[...] += jnp.dot(a_ref[...], s_ref[...],
                                preferred_element_type=jnp.float32)

    @pl.when(k == cnt - 1)
    def _():
        h = jnp.maximum(acc_ref[...], 0.0).astype(jnp.bfloat16)
        o_ref[...] = jnp.dot(
            h, w2_ref[...], preferred_element_type=jnp.float32
        ).astype(o_ref.dtype)


def _agg_logsoftmax_kernel(bids_ref, cnts_ref, a_ref, s_ref, o_ref, acc_ref,
                           *, nclass):
    i = pl.program_id(0)
    k = pl.program_id(1)
    cnt = cnts_ref[i]

    @pl.when(k == 0)
    def _():
        acc_ref[...] = jnp.dot(a_ref[...], s_ref[...],
                               preferred_element_type=jnp.float32)

    @pl.when(jnp.logical_and(k > 0, k < cnt))
    def _():
        acc_ref[...] += jnp.dot(a_ref[...], s_ref[...],
                                preferred_element_type=jnp.float32)

    @pl.when(k == cnt - 1)
    def _():
        z = acc_ref[...]
        # NOTE: the output block spans the FULL padded class width, so the
        # block-local column iota equals the global class index; mask padded
        # classes out of the softmax reduction (padded cols sliced off later).
        col = lax.broadcasted_iota(jnp.int32, z.shape, 1)
        valid = col < nclass
        zm = jnp.where(valid, z, -jnp.inf)
        m = jnp.max(zm, axis=1, keepdims=True)
        e = jnp.where(valid, jnp.exp(zm - m), 0.0)
        lse = jnp.log(jnp.sum(e, axis=1, keepdims=True)) + m
        o_ref[...] = (z - lse).astype(o_ref.dtype)


def _aggregate(a, s, bids, counts, *, tm, tk, nnz_blocks, w2=None, nclass=0):
    n_pad = a.shape[0]
    f_in = s.shape[1]
    nbr = n_pad // tm
    max_blocks = bids.shape[1]

    if w2 is not None:
        f_out = w2.shape[1]
        kernel = _agg_relu_w2_kernel
        in_specs = [
            pl.BlockSpec((tm, tk), lambda i, k, b, c: (i, b[i, k])),
            pl.BlockSpec((tk, f_in), lambda i, k, b, c: (b[i, k], 0)),
            pl.BlockSpec((f_in, f_out), lambda i, k, b, c: (0, 0)),
        ]
        args = (bids, counts, a, s, w2)
        out_dtype = jnp.bfloat16
        extra_flops = 2 * n_pad * f_in * f_out
        w2_bytes = f_in * f_out * 2
        trans = 0
    else:
        f_out = f_in
        kernel = functools.partial(_agg_logsoftmax_kernel, nclass=nclass)
        in_specs = [
            pl.BlockSpec((tm, tk), lambda i, k, b, c: (i, b[i, k])),
            pl.BlockSpec((tk, f_in), lambda i, k, b, c: (b[i, k], 0)),
        ]
        args = (bids, counts, a, s)
        out_dtype = jnp.float32
        extra_flops = 0
        w2_bytes = 0
        trans = n_pad * f_out

    out_itemsize = jnp.dtype(out_dtype).itemsize
    buf = (2 * tm * tk * 2            # A blocks (bf16, double buffered)
           + 2 * tk * f_in * 2        # S blocks
           + 2 * w2_bytes             # resident W2 (if fused)
           + 2 * tm * f_out * out_itemsize  # output blocks
           + tm * f_in * 4)           # f32 accumulator scratch

    return pl.pallas_call(
        kernel,
        out_shape=jax.ShapeDtypeStruct((n_pad, f_out), out_dtype),
        grid_spec=pltpu.PrefetchScalarGridSpec(
            num_scalar_prefetch=2,
            grid=(nbr, max_blocks),
            in_specs=in_specs,
            out_specs=pl.BlockSpec((tm, f_out), lambda i, k, b, c: (i, 0)),
            scratch_shapes=[pltpu.VMEM((tm, f_in), jnp.float32)],
        ),
        compiler_params=pltpu.CompilerParams(
            dimension_semantics=("parallel", "arbitrary"),
            vmem_limit_bytes=_vmem_limit(buf)),
        cost_estimate=pl.CostEstimate(
            flops=int(2 * nnz_blocks * tm * tk * f_in + extra_flops),
            transcendentals=int(trans),
            bytes_accessed=int(nnz_blocks * tm * tk * 2 + s.size * 2
                               + w2_bytes + n_pad * f_out * out_itemsize),
        ),
    )(*args)


# ---------------------------------------------------------------------------
# One-time setup: padding, bf16 cast, block-sparsity schedule (hoisted out of
# the per-call forward path).
# ---------------------------------------------------------------------------
def _block_metadata(a_np, tm, tk):
    n_pad = a_np.shape[0]
    nbr, nbk = n_pad // tm, n_pad // tk
    nz = np.any(a_np.reshape(nbr, tm, nbk, tk) != 0.0, axis=(1, 3))
    counts = np.maximum(nz.sum(axis=1), 1).astype(np.int32)
    max_blocks = int(counts.max())
    bids = np.zeros((nbr, max_blocks), dtype=np.int32)
    for i in range(nbr):
        ids = np.flatnonzero(nz[i]).astype(np.int32)
        if ids.size == 0:
            ids = np.zeros((1,), dtype=np.int32)
        bids[i, :ids.size] = ids
        bids[i, ids.size:] = ids[-1]   # repeat last valid index -> no extra DMA
    return jnp.asarray(bids), jnp.asarray(counts), max_blocks, int(nz.sum())


def prepare_gcn(a_norm, w1, w2):
    n = a_norm.shape[0]
    nfeat, nhid = w1.shape
    nclass = w2.shape[1]

    tm, tk = _pick_tiles(n)
    n_pad = _round_up(n, tk)           # tk is a multiple of tm
    f_pad = _round_up(nfeat, LANE)
    h_pad = _round_up(nhid, LANE)
    c_pad = _round_up(nclass, LANE)

    # Lane-dense zero padding; cast MXU operands to bf16 (f32 accumulation).
    ap = jnp.zeros((n_pad, n_pad), jnp.bfloat16).at[:n, :n].set(
        a_norm.astype(jnp.bfloat16))
    w1p = jnp.zeros((f_pad, h_pad), jnp.bfloat16).at[:nfeat, :nhid].set(
        w1.astype(jnp.bfloat16))
    w2p = jnp.zeros((h_pad, c_pad), jnp.bfloat16).at[:nhid, :nclass].set(
        w2.astype(jnp.bfloat16))

    a_np = np.zeros((n_pad, n_pad), np.float32)
    a_np[:n, :n] = np.asarray(a_norm, dtype=np.float32)
    bids, counts, _, nnz = _block_metadata(a_np, tm, tk)

    return dict(n=n, nfeat=nfeat, nclass=nclass,
                tm=tm, tk=tk, n_pad=n_pad, f_pad=f_pad,
                ap=ap, w1p=w1p, w2p=w2p,
                bids=bids, counts=counts, nnz_blocks=nnz)


# ---------------------------------------------------------------------------
# Full forward:  log_softmax(A @ relu(A @ (X W1)) @ W2)
# ---------------------------------------------------------------------------
def gcn_forward(x, params):
    p = params
    xp = jnp.zeros((p["n_pad"], p["f_pad"]), jnp.bfloat16).at[
        :p["n"], :p["nfeat"]].set(x.astype(jnp.bfloat16))

    # layer 1 transform:  S1 = X @ W1
    s1 = _transform(xp, p["w1p"], row_tile=p["tm"])

    # layer 1 aggregate + fused layer-2 transform:  S2 = relu(A @ S1) @ W2
    # TODO(synk): F.dropout(training=True) not reproduced; eval semantics used.
    s2 = _aggregate(p["ap"], s1, p["bids"], p["counts"],
                    tm=p["tm"], tk=p["tk"], nnz_blocks=p["nnz_blocks"],
                    w2=p["w2p"])

    # layer 2 aggregate + masked log_softmax:  out = log_softmax(A @ S2)
    out = _aggregate(p["ap"], s2, p["bids"], p["counts"],
                     tm=p["tm"], tk=p["tk"], nnz_blocks=p["nnz_blocks"],
                     nclass=p["nclass"])

    return out[:p["n"], :p["nclass"]]


def xavier_uniform(key, fan_in, fan_out):
    bound = jnp.sqrt(6.0 / (fan_in + fan_out))
    return jax.random.uniform(
        key, (fan_in, fan_out), dtype=jnp.float32, minval=-bound, maxval=bound)


def reference_forward(x, a_norm, w1, w2):
    h1 = jnp.maximum(a_norm @ (x @ w1), 0.0)
    z = a_norm @ (h1 @ w2)
    return jax.nn.log_softmax(z, axis=1)


if __name__ == "__main__":
    # Small shapes consistent with the module: N nodes, nfeat -> nhid -> nclass.
    N, NFEAT, NHID, NCLASS = 8, 16, 32, 8

    key = jax.random.PRNGKey(0)
    k_x, k_w1, k_w2 = jax.random.split(key, 3)

    # Checkerboard adjacency like the module's example A, extended to N nodes.
    ii = jnp.arange(N)
    A = (((ii[:, None] + ii[None, :]) % 2) == 1).astype(jnp.float32)
    A_norm = normalize_adj(A)

    x = jax.random.normal(k_x, (N, NFEAT), dtype=jnp.float32)
    w1 = xavier_uniform(k_w1, NFEAT, NHID)
    w2 = xavier_uniform(k_w2, NHID, NCLASS)

    params = prepare_gcn(A_norm, w1, w2)       # one-time padding + schedule
    out = jax.block_until_ready(gcn_forward(x, params))
    ref = reference_forward(x, A_norm, w1, w2)

    assert out.shape == (N, NCLASS)
    # bf16 MXU operands with f32 accumulation -> relaxed tolerance vs the
    # pure-f32 JAX reference.
    assert bool(jnp.allclose(out, ref, atol=5e-2, rtol=5e-2)), \
        "mismatch vs JAX reference"

    print("KERNEL_OK")
</pallas_src>

<mosaic_0001>
module attributes {stable_mosaic.version = 11 : i64} {
  func.func @_xw_kernel(%arg0: i32, %arg1: memref<128x128xbf16, #tpu.memory_space<vmem>>, %arg2: memref<128x128xbf16, #tpu.memory_space<vmem>>, %arg3: memref<128x128xbf16, #tpu.memory_space<vmem>>) attributes {dimension_semantics = [#tpu.dimension_semantics<parallel>], iteration_bounds = array<i64: 1>, scalar_prefetch = 0 : i64, scratch_operands = 0 : i64, tpu.core_type = #tpu.core_type<tc>, window_params = [{transform_indices = @transform_0, window_bounds = array<i64: 128, 128>}, {pipeline_mode = #tpu.pipeline_mode<synchronous>, transform_indices = @transform_1, window_bounds = array<i64: 128, 128>}, {transform_indices = @transform_2, window_bounds = array<i64: 128, 128>}]} {
    %c0 = arith.constant 0 : index
    %c0_0 = arith.constant 0 : index
    %0 = vector.load %arg1[%c0, %c0_0] : memref<128x128xbf16, #tpu.memory_space<vmem>>, vector<128x128xbf16>
    %c0_1 = arith.constant 0 : index
    %c0_2 = arith.constant 0 : index
    %1 = vector.load %arg2[%c0_1, %c0_2] : memref<128x128xbf16, #tpu.memory_space<vmem>>, vector<128x128xbf16>
    %cst = arith.constant dense<0.000000e+00> : vector<128x128xf32>
    %2 = tpu.matmul %0, %1, %cst {dimension_numbers = #tpu.dot_dimension_numbers<[1], [0], [0], [1], [0, 0, 1, 1], [], []>} : vector<128x128xbf16>, vector<128x128xbf16>, vector<128x128xf32> -> vector<128x128xf32>
    %3 = arith.truncf %2 : vector<128x128xf32> to vector<128x128xbf16>
    %c0_3 = arith.constant 0 : index
    %c0_4 = arith.constant 0 : index
    %4 = vector.load %arg3[%c0_3, %c0_4] : memref<128x128xbf16, #tpu.memory_space<vmem>>, vector<128x128xbf16>
    tpu.vector_store %arg3[%c0_3, %c0_4], %3 {strides = array<i32>} : memref<128x128xbf16, #tpu.memory_space<vmem>>, vector<128x128xbf16>,
    return
  }
  func.func @transform_0(%arg0: i32) -> (i32, i32) {
    %c0_i32 = arith.constant 0 : i32
    %c0_i32_0 = arith.constant 0 : i32
    return %arg0, %c0_i32 : i32, i32
  }
  func.func @transform_1(%arg0: i32) -> (i32, i32) {
    %c0_i32 = arith.constant 0 : i32
    %c0_i32_0 = arith.constant 0 : i32
    %c0_i32_1 = arith.constant 0 : i32
    return %c0_i32, %c0_i32_0 : i32, i32
  }
  func.func @transform_2(%arg0: i32) -> (i32, i32) {
    %c0_i32 = arith.constant 0 : i32
    %c0_i32_0 = arith.constant 0 : i32
    return %arg0, %c0_i32 : i32, i32
  }
}

</mosaic_0001>

<bundles_post_ra>
// kernel: tpu_custom_call.1
= control target key start
LH: loop header
LB: loop body
LE: loop exit
PB: predicated region body
PF: predicated region fallthrough
CT: control target
= control target key end

     0   :  { %7 = vsyncpa [#allocation3], 0  ;;  %s545_s0 = inlined_call_operand.hbm [shape: bf16[128,128], index: 0, kind: input, shape index: {}]   ;;  %s546_s1 = inlined_call_operand.hbm [shape: bf16[128,128], index: 1, kind: input, shape index: {}]   ;;  %s547_s2 = inlined_call_operand.hbm [shape: bf16[128,128], index: 2, kind: output, shape index: {}]  }
   0x1   :  { %8 = vsyncpa [#allocation6], 0 }
   0x2   :  { %9 = vsyncpa [#allocation4], 0  ;;  %s14_s11 = sshll.u32 %s545_s0, 4  ;;  %s507_s12 = smov [#allocation2]   ;;  %s15_s11 = int_to_ptr.hbm [resolvable:$true] %s14_s11 }
   0x3   :  { %s16_s13 = sshll.u32 %s507_s12, 4  ;;  %s27_s16 = sshll.u32 %s546_s1, 4  ;;  %s17_s13 = int_to_ptr.vmem [resolvable:$true] %s16_s13  ;;  %s28_s16 = int_to_ptr.hbm [resolvable:$true] %s27_s16 }
   0x4   :  { %s508_s17 = smov 64   ;;  %s509_s18 = smov 4  }
   0x5   :  { %22 = dma.hbm_to_vmem [thread:$0]  %s15_s11, 1024, %s17_s13, [#allocation3], %s508_s17, %s508_s17, %s509_s18  }
   0x6   :  { %s510_s19 = smov [#allocation5]  }
   0x7   :  { %s29_s20 = sshll.u32 %s510_s19, 4  ;;  %s30_s20 = int_to_ptr.vmem [resolvable:$true] %s29_s20 }
   0x8   :  { %35 = dma.hbm_to_vmem [thread:$0]  %s28_s16, 1024, %s30_s20, [#allocation6], %s508_s17, %s508_s17, %s509_s18  }
   0x9   :  { %501 = dma.done.wait [#allocation3], 1024  }
   0xa   :  { %502 = vsyncadd [#allocation3], 4294966272 }
   0xb   :  { %503 = dma.done.wait [#allocation6], 1024  }
   0xc   :  { %504 = vsyncadd [#allocation6], 4294966272  ;;  %v352_v0 = vld [vmem:[#allocation5 + $0x38] sm:$0xff]  ;;  %v351_v1 = vld [vmem:[#allocation5 + $0x30] sm:$0xff]  ;;  %s511_s0 = smov [#allocation7]   ;;  %s259_s23 = sshll.u32 %s547_s2, 4  ;;  %s260_s23 = int_to_ptr.hbm [resolvable:$true] %s259_s23 }
   0xd   :  { %172 = vmatpush.bf16.msra.mxu0 %v352_v0  ;;  %400 = vmatpush.bf16.msra.mxu1 %v352_v0  ;;  %v350_v2 = vld [vmem:[#allocation5 + $0x28] sm:$0xff]  ;;  %v349_v3 = vld [vmem:[#allocation5 + $0x20] sm:$0xff]  ;;  %v348_v4 = vld [vmem:[#allocation5 + $0x18] sm:$0xff]  ;;  %s257_s1 = sshll.u32 %s511_s0, 4  ;;  %s258_s1 = int_to_ptr.vmem [resolvable:$true] %s257_s1 }
   0xe   :  { %401 = vmatpush.bf16.msra.mxu2 %v352_v0  ;;  %402 = vmatpush.bf16.msra.mxu3 %v352_v0  ;;  %v347_v5 = vld [vmem:[#allocation5 + $0x10] sm:$0xff]  ;;  %v346_v6 = vld [vmem:[#allocation5 + $0x8] sm:$0xff]  ;;  %v345_v7 = vld [vmem:[#allocation5] sm:$0xff] }
   0xf   :  { %v337_v8 = vld [vmem:[#allocation2] sm:$0xff]  ;;  %v339_v9 = vld [vmem:[#allocation2 + $0x10] sm:$0xff]  ;;  %v338_v12 = vld [vmem:[#allocation2 + $0x8] sm:$0xff] }
  0x10   :  { %v341_v10 = vld [vmem:[#allocation2 + $0x20] sm:$0xff]  ;;  %v343_v11 = vld [vmem:[#allocation2 + $0x30] sm:$0xff]  ;;  %v340_v13 = vld [vmem:[#allocation2 + $0x18] sm:$0xff] }
  0x11   :  { %173 = vmatpush.bf16.msra.mxu0 %v351_v1  ;;  %403 = vmatpush.bf16.msra.mxu1 %v351_v1  ;;  %v342_v14 = vld [vmem:[#allocation2 + $0x28] sm:$0xff]  ;;  %v344_v15 = vld [vmem:[#allocation2 + $0x38] sm:$0xff] }
  0x12   :  { %404 = vmatpush.bf16.msra.mxu2 %v351_v1  ;;  %405 = vmatpush.bf16.msra.mxu3 %v351_v1 }
  0x15   :  { %174 = vmatpush.bf16.msra.mxu0 %v350_v2  ;;  %406 = vmatpush.bf16.msra.mxu1 %v350_v2 }
  0x16   :  { %407 = vmatpush.bf16.msra.mxu2 %v350_v2  ;;  %408 = vmatpush.bf16.msra.mxu3 %v350_v2 }
  0x19   :  { %175 = vmatpush.bf16.msra.mxu0 %v349_v3  ;;  %409 = vmatpush.bf16.msra.mxu1 %v349_v3 }
  0x1a   :  { %410 = vmatpush.bf16.msra.mxu2 %v349_v3  ;;  %411 = vmatpush.bf16.msra.mxu3 %v349_v3 }
  0x1d   :  { %176 = vmatpush.bf16.msra.mxu0 %v348_v4  ;;  %412 = vmatpush.bf16.msra.mxu1 %v348_v4 }
  0x1e   :  { %413 = vmatpush.bf16.msra.mxu2 %v348_v4  ;;  %414 = vmatpush.bf16.msra.mxu3 %v348_v4 }
  0x21   :  { %177 = vmatpush.bf16.msra.mxu0 %v347_v5  ;;  %415 = vmatpush.bf16.msra.mxu1 %v347_v5 }
  0x22   :  { %416 = vmatpush.bf16.msra.mxu2 %v347_v5  ;;  %417 = vmatpush.bf16.msra.mxu3 %v347_v5 }
  0x25   :  { %178 = vmatpush.bf16.msra.mxu0 %v346_v6  ;;  %418 = vmatpush.bf16.msra.mxu1 %v346_v6 }
  0x26   :  { %419 = vmatpush.bf16.msra.mxu2 %v346_v6  ;;  %420 = vmatpush.bf16.msra.mxu3 %v346_v6 }
  0x29   :  { %179 = vmatpush.bf16.msra.mxu0 %v345_v7  ;;  %421 = vmatpush.bf16.msra.mxu1 %v345_v7 }
  0x2a   :  { %422 = vmatpush.bf16.msra.mxu2 %v345_v7  ;;  %423 = vmatpush.bf16.msra.mxu3 %v345_v7 }
  0x2c   :  { %180 = vmatmul.bf16.vlgmr.msra.gmra.mxu0 %v337_v8  ;;  %190 = vmatmul.bf16.vlgmr.msra.gmra.mxu1 %v339_v9 }
  0x2d   :  { %200 = vmatmul.bf16.vlgmr.msra.gmra.mxu2 %v341_v10  ;;  %210 = vmatmul.bf16.vlgmr.msra.gmra.mxu3 %v343_v11 }
  0x3c   :  { %185 = vmatmul.bf16.gmra.mxu0 %v338_v12  ;;  %195 = vmatmul.bf16.gmra.mxu1 %v340_v13 }
  0x3d   :  { %205 = vmatmul.bf16.gmra.mxu2 %v342_v14  ;;  %215 = vmatmul.bf16.gmra.mxu3 %v344_v15 }
  0xa9   :  { %v181_v16 = vpop.f32.mrf.mxu0  ;;  %v191_v17 = vpop.f32.mrf.mxu1 }
  0xb0   :  { %v201_v18 = vpop.f32.mrf.mxu2  ;;  %v211_v19 = vpop.f32.mrf.mxu3 }
  0xb1   :  { %v183_v20 = vpop.f32.mrf.mxu0  ;;  %v193_v21 = vpop.f32.mrf.mxu1 }
  0xb2   :  { %v356_v22 = vpack.c.bf16 %v183_v20, %v181_v16  ;;  %v366_v23 = vpack.c.bf16 %v193_v21, %v191_v17 }
  0xb4   :  { %357 = vst [vmem:[#allocation7] sm:$0xff] %v356_v22  }
  0xb5   :  { %394 = vst [vmem:[#allocation7 + $0x10] sm:$0xff] %v366_v23  }
  0xb8   :  { %v203_v24 = vpop.f32.mrf.mxu2  ;;  %v213_v25 = vpop.f32.mrf.mxu3 }
  0xb9   :  { %v376_v26 = vpack.c.bf16 %v203_v24, %v201_v18  ;;  %v386_v27 = vpack.c.bf16 %v213_v25, %v211_v19  ;;  %v186_v28 = vpop.f32.mrf.mxu0  ;;  %v196_v29 = vpop.f32.mrf.mxu1 }
  0xbb   :  { %396 = vst [vmem:[#allocation7 + $0x20] sm:$0xff] %v376_v26  }
  0xbc   :  { %398 = vst [vmem:[#allocation7 + $0x30] sm:$0xff] %v386_v27  }
  0xc0   :  { %v206_v30 = vpop.f32.mrf.mxu2  ;;  %v216_v31 = vpop.f32.mrf.mxu3 }
  0xc1   :  { %v188_v32 = vpop.f32.mrf.mxu0  ;;  %v198_v33 = vpop.f32.mrf.mxu1 }
  0xc2   :  { %v361_v34 = vpack.c.bf16 %v188_v32, %v186_v28  ;;  %v371_v35 = vpack.c.bf16 %v198_v33, %v196_v29 }
  0xc4   :  { %393 = vst [vmem:[#allocation7 + $0x8] sm:$0xff] %v361_v34  }
  0xc5   :  { %395 = vst [vmem:[#allocation7 + $0x18] sm:$0xff] %v371_v35  }
  0xc8   :  { %v208_v36 = vpop.f32.mrf.mxu2  ;;  %v218_v37 = vpop.f32.mrf.mxu3 }
  0xc9   :  { %v381_v38 = vpack.c.bf16 %v208_v36, %v206_v30  ;;  %v391_v39 = vpack.c.bf16 %v218_v37, %v216_v31 }
  0xcb   :  { %397 = vst [vmem:[#allocation7 + $0x28] sm:$0xff] %v381_v38  }
  0xcc   :  { %399 = vst [vmem:[#allocation7 + $0x38] sm:$0xff] %v391_v39  }
  0xcd   :  { %265 = dma.vmem_to_hbm [thread:$0]  %s258_s1, 1024, %s260_s23, [#allocation4], %s508_s17, %s508_s17, %s509_s18  }
  0xce   :  { %505 = dma.done.wait [#allocation4], 1024  }
  0xcf   :  { %506 = vsyncadd [#allocation4], 4294966272 }
  0xd0   :  { %270 = vsyncpa [#allocation3], 1 }
  0xd1   :  { %271 = vsyncpa [#allocation6], 1 }
  0xd2   :  { %272 = vsyncpa [#allocation4], 1 }

</bundles_post_ra>
